<compile_context>
chip_gen: v5e
topology: v5e:2x2
jax: 0.10.0
libtpu: 0.0.40
codegen_flags: <defaults>
</compile_context>

<pallas_src>
import functools

import jax
import jax.numpy as jnp
from jax.experimental import pallas as pl
from jax.experimental.pallas import tpu as pltpu


# ---------------------------------------------------------------------------
# kernel
# ---------------------------------------------------------------------------
def make_rdb_kernel(H, W, C0, G, L, mm_dtype, roll_sign):
    """RDB kernel for static (H, W, nChannels, growthRate, nDenselayer).

    Ref order:
      masks (9, H*W) f32, x (1, C0, H*W),
      per dense layer l: [w_piece_s (G, 9*C_s) for s in 0..l], bias (G, 1),
      1x1 conv:          [w11_piece_s (C0, C_s) for s in 0..L], bias (C0, 1),
      out (1, C0, H*W).
    """
    HW = H * W

    def kernel(*refs):
        idx = 0
        mask_ref = refs[idx]; idx += 1
        x_ref = refs[idx]; idx += 1
        dense_w, dense_b = [], []
        for l in range(L):
            dense_w.append([refs[idx + s] for s in range(l + 1)]); idx += l + 1
            dense_b.append(refs[idx]); idx += 1
        w11 = [refs[idx + s] for s in range(L + 1)]; idx += L + 1
        b11_ref = refs[idx]; idx += 1
        out_ref = refs[idx]; idx += 1
        assert idx == len(refs)

        masks = mask_ref[...]                     # (9, HW) 0/1 SAME-padding masks
        x_f32 = x_ref[0].astype(jnp.float32)      # (C0, HW)

        def tap_stack(slab):
            """(C, HW) -> (9*C, HW): the 9 shifted+masked 3x3 taps stacked on K."""
            taps = []
            for dy in range(3):
                for dx in range(3):
                    s_off = (dy - 1) * W + (dx - 1)      # flat-index source offset
                    if s_off == 0:
                        taps.append(slab)                # center tap: no shift/mask
                        continue
                    shifted = pltpu.roll(slab, shift=(roll_sign * s_off) % HW, axis=1)
                    t = dy * 3 + dx
                    taps.append(shifted * masks[t:t + 1])
            # concat in f32 (8-row-aligned pieces), one cast to the matmul dtype
            return jnp.concatenate(taps, axis=0).astype(mm_dtype)

        slabs = [x_f32]               # per-source slabs: the logical torch.cat
        tapped = [tap_stack(x_f32)]   # cached tap-stacked slabs (matmul dtype)

        # dense layers: 3x3 conv (pad=1) + bias + relu; "concat" == new slab
        for l in range(L):
            acc = jnp.zeros((G, HW), jnp.float32)
            for s in range(l + 1):
                acc = acc + jnp.dot(dense_w[l][s][...], tapped[s],
                                    preferred_element_type=jnp.float32)
            y = jnp.maximum(acc + dense_b[l][...], 0.0)          # (G, HW) f32
            slabs.append(y)
            if l + 1 < L:                                        # last taps unused
                tapped.append(tap_stack(y))

        # 1x1 conv over the (logically) concatenated features + residual
        res = jnp.zeros((C0, HW), jnp.float32)
        for s in range(L + 1):
            res = res + jnp.dot(w11[s][...], slabs[s].astype(mm_dtype),
                                preferred_element_type=jnp.float32)
        res = res + b11_ref[...] + x_f32
        out_ref[0] = res.astype(out_ref.dtype)

    return kernel


# ---------------------------------------------------------------------------
# wrapper
# ---------------------------------------------------------------------------
def rdb_pallas(x_nchw, params, *, matmul_dtype=jnp.bfloat16, roll_matches_jnp=True):
    """params = {"dense": [(w (3,3,Cin,G), b (1,G)), ...],
                 "conv1x1": (w (C_total, C0), b (1, C0))}"""
    N, C0, H, W = x_nchw.shape
    HW = H * W
    dense = params["dense"]
    w11, b11 = params["conv1x1"]
    L = len(dense)
    G = dense[0][0].shape[-1]
    C_total = C0 + L * G
    assert w11.shape == (C_total, C0)

    # source slabs of the logical concat: [x, out_0, ..., out_{L-1}]
    widths = [C0] + [G] * L
    offsets = [0]
    for wdt in widths[:-1]:
        offsets.append(offsets[-1] + wdt)

    # NCHW -> (N, C0, H*W): trailing-dim collapse only, no transpose/relayout
    x_flat = x_nchw.reshape(N, C0, HW)

    # SAME-padding validity masks for the 9 taps of a 3x3 conv, (9, HW) f32
    p = jnp.arange(HW, dtype=jnp.int32)
    py, px = p // W, p % W
    masks = []
    for dy in range(3):
        for dx in range(3):
            oy, ox = dy - 1, dx - 1
            masks.append((py + oy >= 0) & (py + oy < H) &
                         (px + ox >= 0) & (px + ox < W))
    mask_arr = jnp.stack(masks, axis=0).astype(jnp.float32)

    inputs = [mask_arr, x_flat]
    in_specs = [pl.BlockSpec((9, HW), lambda n: (0, 0)),
                pl.BlockSpec((1, C0, HW), lambda n: (n, 0, 0))]

    def add_full(arr):
        inputs.append(arr)
        in_specs.append(pl.BlockSpec(arr.shape, lambda n: (0,) * arr.ndim))

    # dense-layer weights, split per source slab and pre-transposed for the
    # flipped (lane-dense) matmul: (G, 9*C_s), K flattening order (dy, dx, c)
    for l, (w, b) in enumerate(dense):
        C_in = C0 + l * G
        assert w.shape == (3, 3, C_in, G)
        for s in range(l + 1):
            o, cs = offsets[s], widths[s]
            add_full(w[:, :, o:o + cs, :].reshape(9 * cs, G).T.astype(matmul_dtype))
        add_full(b.reshape(G, 1).astype(jnp.float32))

    # 1x1 conv weights, split per source slab: (C0, C_s)
    for s in range(L + 1):
        o, cs = offsets[s], widths[s]
        add_full(w11[o:o + cs, :].T.astype(matmul_dtype))
    add_full(b11.reshape(C0, 1).astype(jnp.float32))

    kernel = make_rdb_kernel(H, W, C0, G, L, matmul_dtype,
                             -1 if roll_matches_jnp else 1)

    out_flat = pl.pallas_call(
        kernel,
        out_shape=jax.ShapeDtypeStruct((N, C0, HW), x_nchw.dtype),
        grid=(N,),
        in_specs=in_specs,
        out_specs=pl.BlockSpec((1, C0, HW), lambda n: (n, 0, 0)),
        compiler_params=pltpu.CompilerParams(
            dimension_semantics=("parallel",),          # v7x: 2 TCs over batch
            vmem_limit_bytes=32 * 1024 * 1024,
        ),
    )(*inputs)

    return out_flat.reshape(N, C0, H, W)


# ---------------------------------------------------------------------------
# one-shot probe: pltpu.roll rotation direction (guards against convention drift)
# ---------------------------------------------------------------------------
def _roll_matches_jnp_semantics():
    def k(x_ref, o_ref):
        o_ref[...] = pltpu.roll(x_ref[...], shift=3, axis=1)
    x = jnp.arange(8 * 256, dtype=jnp.float32).reshape(8, 256)
    y = pl.pallas_call(k, out_shape=jax.ShapeDtypeStruct((8, 256), jnp.float32))(x)
    return bool(jnp.array_equal(y, jnp.roll(x, 3, axis=1)))


# ---------------------------------------------------------------------------
# deterministic parameter init (Conv2d-style uniform(-1/sqrt(fan_in)))
# ---------------------------------------------------------------------------
def init_rdb_params(key, nChannels, nDenselayer, growthRate):
    dense = []
    c = nChannels
    for _ in range(nDenselayer):
        key, kw, kb = jax.random.split(key, 3)
        fan_in = c * 3 * 3
        bound = 1.0 / jnp.sqrt(fan_in)
        w = jax.random.uniform(kw, (3, 3, c, growthRate), jnp.float32, -bound, bound)
        b = jax.random.uniform(kb, (1, growthRate), jnp.float32, -bound, bound)
        dense.append((w, b))
        c += growthRate
    key, kw, kb = jax.random.split(key, 3)
    bound = 1.0 / jnp.sqrt(c)
    w11 = jax.random.uniform(kw, (c, nChannels), jnp.float32, -bound, bound)
    b11 = jax.random.uniform(kb, (1, nChannels), jnp.float32, -bound, bound)
    return {"dense": dense, "conv1x1": (w11, b11)}


# ---------------------------------------------------------------------------
# pure-JAX reference (same math via lax.conv) for the correctness check
# ---------------------------------------------------------------------------
def rdb_reference(x_nchw, params):
    feats = x_nchw
    for (w, b) in params["dense"]:
        y = jax.lax.conv_general_dilated(
            feats, w, window_strides=(1, 1), padding="SAME",
            dimension_numbers=("NCHW", "HWIO", "NCHW"))
        y = jax.nn.relu(y + b.reshape(1, -1, 1, 1))
        feats = jnp.concatenate([feats, y], axis=1)
    w11, b11 = params["conv1x1"]
    y = jnp.einsum("nchw,cd->ndhw", feats, w11) + b11.reshape(1, -1, 1, 1)
    return y + x_nchw


if __name__ == "__main__":
    nChannels, nDenselayer, growthRate = 8, 3, 8
    N, H, W = 2, 16, 16

    key = jax.random.PRNGKey(0)
    kx, kp = jax.random.split(key)
    x = jax.random.normal(kx, (N, nChannels, H, W), jnp.float32)
    params = init_rdb_params(kp, nChannels, nDenselayer, growthRate)

    roll_ok = _roll_matches_jnp_semantics()
    ref = jax.block_until_ready(rdb_reference(x, params))

    # exact-math configuration (f32 matmul inputs)
    f32_fn = jax.jit(functools.partial(
        rdb_pallas, matmul_dtype=jnp.float32, roll_matches_jnp=roll_ok))
    out_f32 = jax.block_until_ready(f32_fn(x, params))
    assert out_f32.shape == (N, nChannels, H, W)
    assert jnp.allclose(out_f32, ref, atol=2e-2, rtol=2e-2), "f32 mismatch vs reference"

    # perf configuration (bf16 matmul inputs, f32 accumulation) -- looser check
    bf16_fn = jax.jit(functools.partial(
        rdb_pallas, matmul_dtype=jnp.bfloat16, roll_matches_jnp=roll_ok))
    out_bf16 = jax.block_until_ready(bf16_fn(x, params))
    assert jnp.allclose(out_bf16, ref, atol=5e-2, rtol=5e-2), "bf16 mismatch vs reference"

    print("KERNEL_OK")
</pallas_src>

<mosaic_0001>
module attributes {stable_mosaic.version = 11 : i64} {
  func.func @k(%arg0: memref<8x256xf32, #tpu.memory_space<vmem>>, %arg1: memref<8x256xf32, #tpu.memory_space<vmem>>) attributes {dimension_semantics = [], scalar_prefetch = 0 : i64, scratch_operands = 0 : i64, tpu.core_type = #tpu.core_type<tc>} {
    %c0 = arith.constant 0 : index
    %c0_0 = arith.constant 0 : index
    %0 = vector.load %arg0[%c0, %c0_0] : memref<8x256xf32, #tpu.memory_space<vmem>>, vector<8x256xf32>
    %c3_i32 = arith.constant 3 : i32
    %1 = tpu.dynamic_rotate %0 by %c3_i32 dim 1 : vector<8x256xf32>, i32 -> vector<8x256xf32>
    %c0_1 = arith.constant 0 : index
    %c0_2 = arith.constant 0 : index
    %2 = vector.load %arg1[%c0_1, %c0_2] : memref<8x256xf32, #tpu.memory_space<vmem>>, vector<8x256xf32>
    tpu.vector_store %arg1[%c0_1, %c0_2], %1 {strides = array<i32>} : memref<8x256xf32, #tpu.memory_space<vmem>>, vector<8x256xf32>,
    return
  }
}

</mosaic_0001>

<bundles_post_ra>
// kernel: tpu_custom_call.1
= control target key start
LH: loop header
LB: loop body
LE: loop exit
PB: predicated region body
PF: predicated region fallthrough
CT: control target
= control target key end

     0   :  { %6 = vsyncpa [#allocation3], 0  ;;  %s127_s0 = inlined_call_operand.hbm [shape: f32[8,256], index: 0, kind: input, shape index: {}]   ;;  %s128_s1 = inlined_call_operand.hbm [shape: f32[8,256], index: 1, kind: output, shape index: {}]  }
   0x1   :  { %7 = vsyncpa [#allocation4], 0  ;;  %s13_s8 = sshll.u32 %s127_s0, 4  ;;  %s108_s9 = smov [#allocation2]   ;;  %s14_s8 = int_to_ptr.hbm [resolvable:$true] %s13_s8 }
   0x2   :  { %s15_s10 = sshll.u32 %s108_s9, 4  ;;  %s16_s10 = int_to_ptr.vmem [resolvable:$true] %s15_s10 }
   0x3   :  { %18 = dma.hbm_to_vmem [thread:$0]  %s14_s8, 256, %s16_s10, [#allocation3]  }
   0x4   :  { %104 = dma.done.wait [#allocation3], 256  }
   0x5   :  { %105 = vsyncadd [#allocation3], 4294967040  ;;  %v23_v0 = vld [vmem:[#allocation2] sm:$0xff]  ;;  %s109_s11 = smov 3   ;;  %v24_v1 = vld [vmem:[#allocation2 + $0x8] sm:$0xff]  ;;  %v29_v2 = vlaneseq  ;;  %s110_s12 = smov [#allocation5]  }
   0x6   :  { %25 = vrot.lane.b32.xlu0 %v23_v0, %s109_s11  ;;  %s41_s13 = sshll.u32 %s110_s12, 4  ;;  %s43_s15 = sshll.u32 %s128_s1, 4  ;;  %s42_s13 = int_to_ptr.vmem [resolvable:$true] %s41_s13  ;;  %s44_s15 = int_to_ptr.hbm [resolvable:$true] %s43_s15 }
   0x7   :  { %v30_v4 = vand.u32 127, %v29_v2 }
   0x9   :  { %vm31_vm0 = vcmp.lt.s32.totalorder %v30_v4, 3 }
   0xe   :  { %27 = vrot.lane.b32.xlu0 %v24_v1, %s109_s11 }
  0x78   :  { %v26_v3 = vpop.permute.xlu0 %25 }
  0x80   :  { %v28_v5 = vpop.permute.xlu0 %27 }
  0x81   :  { %v32_v6 = vsel %vm31_vm0, %v26_v3, %v28_v5  ;;  %v33_v7 = vsel %vm31_vm0, %v28_v5, %v26_v3 }
  0x82   :  { %34 = vst [vmem:[#allocation5] sm:$0xff] %v33_v7 }
  0x83   :  { %35 = vst [vmem:[#allocation5 + $0x8] sm:$0xff] %v32_v6 }
  0x84   :  { %46 = dma.vmem_to_hbm [thread:$0]  %s42_s13, 256, %s44_s15, [#allocation4]  }
  0x85   :  { %106 = dma.done.wait [#allocation4], 256  }
  0x86   :  { %107 = vsyncadd [#allocation4], 4294967040 }
  0x87   :  { %51 = vsyncpa [#allocation3], 1 }
  0x88   :  { %52 = vsyncpa [#allocation4], 1 }

</bundles_post_ra>
